<compile_context>
chip_gen: v7x
topology: tpu7x:2x2x1
jax: 0.10.0
libtpu: 0.0.40
codegen_flags: <defaults>
</compile_context>

<pallas_src>
import numpy as np

import jax
import jax.numpy as jnp
from jax.experimental import pallas as pl
from jax.experimental.pallas import tpu as pltpu


# ---------------------------------------------------------------------------
# Tunables
# ---------------------------------------------------------------------------

# Keep the whole table VMEM-resident when its *padded* footprint is at most
# this many bytes.  4 MiB is conservative: even a worst-case double-buffered
# copy (8 MiB) fits every generation's default scoped-VMEM limit (16 MiB v5e,
# 32 MiB v6e/v7x).  Raise on v5e/v6e (128 MiB physical) for bigger vocabs.
_RESIDENT_TABLE_BYTES = 4 * 1024 * 1024

# Extra pipeline depth for the randomly-addressed per-row HBM DMAs of the
# large-vocab gather path (they are latency-, not bandwidth-, bound).
_PIPELINE_DEPTH = 3


def _round_up(x, m):
    return (x + m - 1) // m * m


def _rows_per_step(d):
    """Rows gathered per grid step: smallest R in {8,16,32} with R*D % 128 == 0
    (lane-dense packed store); fall back to 8 (still amortizes step overhead)."""
    for cand in (8, 16, 32):
        if (cand * d) % 128 == 0:
            return cand
    return 8


# ---------------------------------------------------------------------------
# Kernels
# ---------------------------------------------------------------------------

def _make_gather_kernel(num_rows):
    """Large-vocab path: each of the R row refs was DMA'd from HBM by its
    ids-driven index_map; pack them in-register and do one lane-dense store."""

    def kernel(ids_ref, *refs):
        del ids_ref  # consumed by the index_maps only
        row_refs = refs[:num_rows]      # each (1, 1, D) = table[ids[i*R + k]]
        out_ref = refs[num_rows]        # (1, 1, R*D) packed row-group
        out_ref[...] = jnp.concatenate([r[...] for r in row_refs], axis=-1)

    return kernel


def _make_resident_kernel(num_rows):
    """Small-vocab path: whole (V, D) table is VMEM-resident; gather R rows
    with dynamic sublane reads driven by the scalar-prefetched ids in SMEM."""

    def kernel(ids_ref, table_ref, out_ref):
        base = pl.program_id(0) * num_rows
        rows = [table_ref[pl.ds(ids_ref[base + k], 1), :] for k in range(num_rows)]
        packed = jnp.concatenate(rows, axis=-1)           # (1, R*D)
        out_ref[...] = packed.reshape(out_ref.shape)      # (1, 1, R*D)

    return kernel


# ---------------------------------------------------------------------------
# pallas_call builders
# ---------------------------------------------------------------------------

def _gather_lookup(ids_pad, table, n_steps, rows_per_step, emb_dim, dims):
    """HBM gather: ids (SMEM, scalar prefetch) drive R per-row index_maps."""
    vocab = table.shape[0]
    table3 = table.reshape(vocab, 1, emb_dim)   # trailing dims == block dims
    r, d = rows_per_step, emb_dim

    def build(depth):
        def row_spec(k):
            idx_map = lambda i, ids, k=k: (ids[i * r + k], 0, 0)
            if depth is None:
                return pl.BlockSpec((1, 1, d), idx_map)
            return pl.BlockSpec((1, 1, d), idx_map,
                                pipeline_mode=pl.Buffered(depth))

        grid_spec = pltpu.PrefetchScalarGridSpec(
            num_scalar_prefetch=1,               # ids -> SMEM, feed index_maps
            grid=(n_steps,),
            in_specs=[row_spec(k) for k in range(r)],
            out_specs=pl.BlockSpec((1, 1, r * d), lambda i, ids: (i, 0, 0)),
        )
        return pl.pallas_call(
            _make_gather_kernel(r),
            out_shape=jax.ShapeDtypeStruct((n_steps, 1, r * d), table.dtype),
            grid_spec=grid_spec,
            compiler_params=pltpu.CompilerParams(dimension_semantics=dims),
        )(ids_pad, *([table3] * r))

    if _PIPELINE_DEPTH is not None:
        try:
            return build(_PIPELINE_DEPTH)
        except Exception:
            # pl.Buffered / pipeline_mode unsupported on this jax version:
            # fall back to the default double-buffered pipeline.
            pass
    return build(None)


def _resident_lookup(ids_pad, table, n_steps, rows_per_step, emb_dim, dims):
    """Whole table staged once in VMEM (constant index_map); in-VMEM gather."""
    vocab = table.shape[0]
    r, d = rows_per_step, emb_dim

    grid_spec = pltpu.PrefetchScalarGridSpec(
        num_scalar_prefetch=1,
        grid=(n_steps,),
        in_specs=[pl.BlockSpec((vocab, d), lambda i, ids: (0, 0))],  # resident
        out_specs=pl.BlockSpec((1, 1, r * d), lambda i, ids: (i, 0, 0)),
    )
    return pl.pallas_call(
        _make_resident_kernel(r),
        out_shape=jax.ShapeDtypeStruct((n_steps, 1, r * d), table.dtype),
        grid_spec=grid_spec,
        compiler_params=pltpu.CompilerParams(dimension_semantics=dims),
    )(ids_pad, table)


# ---------------------------------------------------------------------------
# Public lookup wrapper
# ---------------------------------------------------------------------------

def embedding_lookup_pallas(ids, table, *, path="auto",
                            resident_table_bytes=_RESIDENT_TABLE_BYTES):
    """ids: (S,) integer word indices; table: (V, D) float -> (S, D).

    path: "auto" (dispatch on table size), "resident", or "gather".
    NOTE: out-of-range ids are clamped to [0, V-1] rather than raising like
    nn.Embedding (an unchecked OOB block index is the alternative).
    """
    ids = jnp.asarray(ids)
    table = jnp.asarray(table)
    S = int(ids.shape[0])
    V, D = (int(v) for v in table.shape)
    if S == 0:
        return jnp.zeros((0, D), table.dtype)

    ids = jnp.clip(ids.astype(jnp.int32), 0, V - 1)

    R = _rows_per_step(D)
    n_steps = -(-S // R)
    S_pad = n_steps * R
    if S_pad != S:
        # Pad with a valid row index; padded rows are sliced off below.
        ids = jnp.concatenate([ids, jnp.zeros((S_pad - S,), jnp.int32)])

    # Megacore split only when there is enough work to amortize per-core cost.
    dims = ("parallel",) if n_steps >= 8 else ("arbitrary",)

    # Padded VMEM footprint of the table (sublane->8, lane->128).
    padded_bytes = _round_up(V, 8) * _round_up(D, 128) * table.dtype.itemsize
    use_resident = (path == "resident") or (
        path == "auto" and padded_bytes <= resident_table_bytes)

    out3 = None
    if use_resident:
        try:
            out3 = _resident_lookup(ids, table, n_steps, R, D, dims)
        except Exception:
            out3 = None  # fall back to the HBM gather path
    if out3 is None:
        out3 = _gather_lookup(ids, table, n_steps, R, D, dims)

    out = out3.reshape(S_pad, D)   # row-major: same bytes, zero-copy view
    return out[:S, :] if S_pad != S else out


# ---------------------------------------------------------------------------
# Module
# ---------------------------------------------------------------------------

class VanillaWordEmbedding:
    """JAX/Pallas re-implementation of the PyTorch VanillaWordEmbedding.

    Forward-only port.
    # TODO(synk): nn.Embedding parameter gradients / training are not ported.
    """

    def __init__(self, word_to_ix, embedding_dim, key=None):
        if key is None:
            key = jax.random.PRNGKey(0)
        self.word_to_ix = word_to_ix
        self.embedding_dim = embedding_dim
        self.output_dim = embedding_dim
        # nn.Embedding default init ~ N(0, 1); deterministic via PRNGKey.
        self.word_embeddings = jax.random.normal(
            key, (len(word_to_ix), embedding_dim), dtype=jnp.float32)

    def _sentence_ids(self, sentence):
        # Host-side dict lookup once -> single device transfer.
        return jnp.asarray(
            np.asarray([self.word_to_ix[w] for w in sentence], dtype=np.int32))

    def forward_batched(self, sentence, *, path="auto"):
        """sentence: list of strings -> (S, embedding_dim) device array."""
        return embedding_lookup_pallas(
            self._sentence_ids(sentence), self.word_embeddings, path=path)

    def forward(self, sentence):
        """PyTorch-parity path: list of (1, embedding_dim) row vectors.

        One Pallas kernel + one device->host transfer; the list entries are
        zero-copy host row views (avoids S separate device slice dispatches).
        Prefer forward_batched() in performance-sensitive code.
        """
        embeds_mat = np.asarray(self.forward_batched(sentence))   # (S, D) host
        return [embeds_mat[i:i + 1, :] for i in range(len(sentence))]


# ---------------------------------------------------------------------------
# Demo / correctness check
# ---------------------------------------------------------------------------

if __name__ == "__main__":
    key = jax.random.PRNGKey(0)

    vocab = [f"w{i}" for i in range(16)]
    word_to_ix = {w: i for i, w in enumerate(vocab)}
    embedding_dim = 32

    model = VanillaWordEmbedding(word_to_ix, embedding_dim, key)
    table = model.word_embeddings

    sentence = ["w3", "w0", "w7", "w3", "w15", "w1", "w8", "w2"]   # S=8 (== R)
    sentence_odd = ["w5", "w11", "w2", "w2", "w9"]                 # S=5 (padding)

    def ref_lookup(words):
        ids = jnp.asarray(
            np.asarray([word_to_ix[w] for w in words], dtype=np.int32))
        return np.asarray(jnp.take(table, ids, axis=0))

    # 1) Auto dispatch (small table -> VMEM-resident fast path), S % R == 0.
    out_a = jax.block_until_ready(model.forward_batched(sentence))
    assert out_a.shape == (len(sentence), embedding_dim)
    assert np.allclose(np.asarray(out_a), ref_lookup(sentence), atol=1e-6), \
        "resident/auto path mismatch"

    # 2) Forced HBM index_map gather path (what large vocabularies use).
    ids8 = jnp.asarray(
        np.asarray([word_to_ix[w] for w in sentence], dtype=np.int32))
    out_b = jax.block_until_ready(
        embedding_lookup_pallas(ids8, table, path="gather"))
    assert np.allclose(np.asarray(out_b), ref_lookup(sentence), atol=1e-6), \
        "gather path mismatch"

    # 3) Odd-length sentence (row padding + un-padding) on both paths.
    ids5 = jnp.asarray(
        np.asarray([word_to_ix[w] for w in sentence_odd], dtype=np.int32))
    for p in ("resident", "gather"):
        out_c = jax.block_until_ready(
            embedding_lookup_pallas(ids5, table, path=p))
        assert out_c.shape == (len(sentence_odd), embedding_dim)
        assert np.allclose(np.asarray(out_c), ref_lookup(sentence_odd),
                           atol=1e-6), f"{p} path (padded) mismatch"

    # 4) PyTorch-parity list-of-(1, D) path.
    embeds = model.forward(sentence)
    assert len(embeds) == len(sentence)
    assert all(e.shape == (1, embedding_dim) for e in embeds)
    assert np.allclose(np.concatenate(embeds, axis=0), ref_lookup(sentence),
                       atol=1e-6), "list path mismatch"

    print("KERNEL_OK")
</pallas_src>

<mosaic_0001>
module attributes {stable_mosaic.version = 11 : i64} {
  func.func @kernel(%arg0: i32, %arg1: memref<8xi32, #tpu.memory_space<smem>>, %arg2: memref<16x32xf32, #tpu.memory_space<vmem>>, %arg3: memref<1x1x256xf32, #tpu.memory_space<vmem>>) attributes {dimension_semantics = [#tpu.dimension_semantics<arbitrary>], iteration_bounds = array<i64: 1>, scalar_prefetch = 1 : i64, scratch_operands = 0 : i64, tpu.core_type = #tpu.core_type<tc>, window_params = [{pipeline_mode = #tpu.pipeline_mode<synchronous>, transform_indices = @transform_0, window_bounds = array<i64: 16, 32>}, {transform_indices = @transform_1, window_bounds = array<i64: 1, 1, 256>}]} {
    %c8_i32 = arith.constant 8 : i32
    %0 = arith.muli %arg0, %c8_i32 : i32
    %c0_i32 = arith.constant 0 : i32
    %1 = arith.addi %0, %c0_i32 : i32
    %2 = arith.index_cast %1 : i32 to index
    %3 = memref.load %arg1[%2] : memref<8xi32, #tpu.memory_space<smem>>
    %4 = arith.index_cast %3 : i32 to index
    %c0 = arith.constant 0 : index
    %5 = vector.load %arg2[%4, %c0] : memref<16x32xf32, #tpu.memory_space<vmem>>, vector<1x32xf32>
    %c1_i32 = arith.constant 1 : i32
    %6 = arith.addi %0, %c1_i32 : i32
    %7 = arith.index_cast %6 : i32 to index
    %8 = memref.load %arg1[%7] : memref<8xi32, #tpu.memory_space<smem>>
    %9 = arith.index_cast %8 : i32 to index
    %c0_0 = arith.constant 0 : index
    %10 = vector.load %arg2[%9, %c0_0] : memref<16x32xf32, #tpu.memory_space<vmem>>, vector<1x32xf32>
    %c2_i32 = arith.constant 2 : i32
    %11 = arith.addi %0, %c2_i32 : i32
    %12 = arith.index_cast %11 : i32 to index
    %13 = memref.load %arg1[%12] : memref<8xi32, #tpu.memory_space<smem>>
    %14 = arith.index_cast %13 : i32 to index
    %c0_1 = arith.constant 0 : index
    %15 = vector.load %arg2[%14, %c0_1] : memref<16x32xf32, #tpu.memory_space<vmem>>, vector<1x32xf32>
    %c3_i32 = arith.constant 3 : i32
    %16 = arith.addi %0, %c3_i32 : i32
    %17 = arith.index_cast %16 : i32 to index
    %18 = memref.load %arg1[%17] : memref<8xi32, #tpu.memory_space<smem>>
    %19 = arith.index_cast %18 : i32 to index
    %c0_2 = arith.constant 0 : index
    %20 = vector.load %arg2[%19, %c0_2] : memref<16x32xf32, #tpu.memory_space<vmem>>, vector<1x32xf32>
    %c4_i32 = arith.constant 4 : i32
    %21 = arith.addi %0, %c4_i32 : i32
    %22 = arith.index_cast %21 : i32 to index
    %23 = memref.load %arg1[%22] : memref<8xi32, #tpu.memory_space<smem>>
    %24 = arith.index_cast %23 : i32 to index
    %c0_3 = arith.constant 0 : index
    %25 = vector.load %arg2[%24, %c0_3] : memref<16x32xf32, #tpu.memory_space<vmem>>, vector<1x32xf32>
    %c5_i32 = arith.constant 5 : i32
    %26 = arith.addi %0, %c5_i32 : i32
    %27 = arith.index_cast %26 : i32 to index
    %28 = memref.load %arg1[%27] : memref<8xi32, #tpu.memory_space<smem>>
    %29 = arith.index_cast %28 : i32 to index
    %c0_4 = arith.constant 0 : index
    %30 = vector.load %arg2[%29, %c0_4] : memref<16x32xf32, #tpu.memory_space<vmem>>, vector<1x32xf32>
    %c6_i32 = arith.constant 6 : i32
    %31 = arith.addi %0, %c6_i32 : i32
    %32 = arith.index_cast %31 : i32 to index
    %33 = memref.load %arg1[%32] : memref<8xi32, #tpu.memory_space<smem>>
    %34 = arith.index_cast %33 : i32 to index
    %c0_5 = arith.constant 0 : index
    %35 = vector.load %arg2[%34, %c0_5] : memref<16x32xf32, #tpu.memory_space<vmem>>, vector<1x32xf32>
    %c7_i32 = arith.constant 7 : i32
    %36 = arith.addi %0, %c7_i32 : i32
    %37 = arith.index_cast %36 : i32 to index
    %38 = memref.load %arg1[%37] : memref<8xi32, #tpu.memory_space<smem>>
    %39 = arith.index_cast %38 : i32 to index
    %c0_6 = arith.constant 0 : index
    %40 = vector.load %arg2[%39, %c0_6] : memref<16x32xf32, #tpu.memory_space<vmem>>, vector<1x32xf32>
    %41 = tpu.concatenate %5, %10, %15, %20, %25, %30, %35, %40 in 1 : vector<1x32xf32>, vector<1x32xf32>, vector<1x32xf32>, vector<1x32xf32>, vector<1x32xf32>, vector<1x32xf32>, vector<1x32xf32>, vector<1x32xf32> -> vector<1x256xf32>
    %42 = vector.shape_cast %41 : vector<1x256xf32> to vector<1x1x256xf32>
    %c0_7 = arith.constant 0 : index
    %c0_8 = arith.constant 0 : index
    %c0_9 = arith.constant 0 : index
    %43 = vector.load %arg3[%c0_7, %c0_8, %c0_9] : memref<1x1x256xf32, #tpu.memory_space<vmem>>, vector<1x1x256xf32>
    tpu.vector_store %arg3[%c0_7, %c0_8, %c0_9], %42 {strides = array<i32>} : memref<1x1x256xf32, #tpu.memory_space<vmem>>, vector<1x1x256xf32>,
    return
  }
  func.func @transform_0(%arg0: i32, %arg1: memref<8xi32, #tpu.memory_space<smem>>) -> (i32, i32) {
    %c0_i32 = arith.constant 0 : i32
    %c0_i32_0 = arith.constant 0 : i32
    %c0_i32_1 = arith.constant 0 : i32
    return %c0_i32, %c0_i32_0 : i32, i32
  }
  func.func @transform_1(%arg0: i32, %arg1: memref<8xi32, #tpu.memory_space<smem>>) -> (i32, i32, i32) {
    %c0_i32 = arith.constant 0 : i32
    %c0_i32_0 = arith.constant 0 : i32
    %c0_i32_1 = arith.constant 0 : i32
    return %arg0, %c0_i32, %c0_i32_0 : i32, i32, i32
  }
}

module attributes {stable_mosaic.version = 11 : i64} {
  func.func @kernel(%arg0: i32, %arg1: memref<8xi32, #tpu.memory_space<smem>>, %arg2: memref<1x1x32xf32, #tpu.memory_space<vmem>>, %arg3: memref<1x1x32xf32, #tpu.memory_space<vmem>>, %arg4: memref<1x1x32xf32, #tpu.memory_space<vmem>>, %arg5: memref<1x1x32xf32, #tpu.memory_space<vmem>>, %arg6: memref<1x1x32xf32, #tpu.memory_space<vmem>>, %arg7: memref<1x1x32xf32, #tpu.memory_space<vmem>>, %arg8: memref<1x1x32xf32, #tpu.memory_space<vmem>>, %arg9: memref<1x1x32xf32, #tpu.memory_space<vmem>>, %arg10: memref<1x1x256xf32, #tpu.memory_space<vmem>>) attributes {dimension_semantics = [#tpu.dimension_semantics<arbitrary>], iteration_bounds = array<i64: 1>, scalar_prefetch = 1 : i64, scratch_operands = 0 : i64, tpu.core_type = #tpu.core_type<tc>, window_params = [{transform_indices = @transform_0, window_bounds = array<i64: 1, 1, 32>}, {transform_indices = @transform_1, window_bounds = array<i64: 1, 1, 32>}, {transform_indices = @transform_2, window_bounds = array<i64: 1, 1, 32>}, {transform_indices = @transform_3, window_bounds = array<i64: 1, 1, 32>}, {transform_indices = @transform_4, window_bounds = array<i64: 1, 1, 32>}, {transform_indices = @transform_5, window_bounds = array<i64: 1, 1, 32>}, {transform_indices = @transform_6, window_bounds = array<i64: 1, 1, 32>}, {transform_indices = @transform_7, window_bounds = array<i64: 1, 1, 32>}, {transform_indices = @transform_8, window_bounds = array<i64: 1, 1, 256>}]} {
    %c0 = arith.constant 0 : index
    %c0_0 = arith.constant 0 : index
    %c0_1 = arith.constant 0 : index
    %0 = vector.load %arg2[%c0, %c0_0, %c0_1] : memref<1x1x32xf32, #tpu.memory_space<vmem>>, vector<1x1x32xf32>
    %c0_2 = arith.constant 0 : index
    %c0_3 = arith.constant 0 : index
    %c0_4 = arith.constant 0 : index
    %1 = vector.load %arg3[%c0_2, %c0_3, %c0_4] : memref<1x1x32xf32, #tpu.memory_space<vmem>>, vector<1x1x32xf32>
    %c0_5 = arith.constant 0 : index
    %c0_6 = arith.constant 0 : index
    %c0_7 = arith.constant 0 : index
    %2 = vector.load %arg4[%c0_5, %c0_6, %c0_7] : memref<1x1x32xf32, #tpu.memory_space<vmem>>, vector<1x1x32xf32>
    %c0_8 = arith.constant 0 : index
    %c0_9 = arith.constant 0 : index
    %c0_10 = arith.constant 0 : index
    %3 = vector.load %arg5[%c0_8, %c0_9, %c0_10] : memref<1x1x32xf32, #tpu.memory_space<vmem>>, vector<1x1x32xf32>
    %c0_11 = arith.constant 0 : index
    %c0_12 = arith.constant 0 : index
    %c0_13 = arith.constant 0 : index
    %4 = vector.load %arg6[%c0_11, %c0_12, %c0_13] : memref<1x1x32xf32, #tpu.memory_space<vmem>>, vector<1x1x32xf32>
    %c0_14 = arith.constant 0 : index
    %c0_15 = arith.constant 0 : index
    %c0_16 = arith.constant 0 : index
    %5 = vector.load %arg7[%c0_14, %c0_15, %c0_16] : memref<1x1x32xf32, #tpu.memory_space<vmem>>, vector<1x1x32xf32>
    %c0_17 = arith.constant 0 : index
    %c0_18 = arith.constant 0 : index
    %c0_19 = arith.constant 0 : index
    %6 = vector.load %arg8[%c0_17, %c0_18, %c0_19] : memref<1x1x32xf32, #tpu.memory_space<vmem>>, vector<1x1x32xf32>
    %c0_20 = arith.constant 0 : index
    %c0_21 = arith.constant 0 : index
    %c0_22 = arith.constant 0 : index
    %7 = vector.load %arg9[%c0_20, %c0_21, %c0_22] : memref<1x1x32xf32, #tpu.memory_space<vmem>>, vector<1x1x32xf32>
    %8 = tpu.concatenate %0, %1, %2, %3, %4, %5, %6, %7 in 2 : vector<1x1x32xf32>, vector<1x1x32xf32>, vector<1x1x32xf32>, vector<1x1x32xf32>, vector<1x1x32xf32>, vector<1x1x32xf32>, vector<1x1x32xf32>, vector<1x1x32xf32> -> vector<1x1x256xf32>
    %c0_23 = arith.constant 0 : index
    %c0_24 = arith.constant 0 : index
    %c0_25 = arith.constant 0 : index
    %9 = vector.load %arg10[%c0_23, %c0_24, %c0_25] : memref<1x1x256xf32, #tpu.memory_space<vmem>>, vector<1x1x256xf32>
    tpu.vector_store %arg10[%c0_23, %c0_24, %c0_25], %8 {strides = array<i32>} : memref<1x1x256xf32, #tpu.memory_space<vmem>>, vector<1x1x256xf32>,
    return
  }
  func.func @transform_0(%arg0: i32, %arg1: memref<8xi32, #tpu.memory_space<smem>>) -> (i32, i32, i32) {
    %c8_i32 = arith.constant 8 : i32
    %0 = arith.muli %arg0, %c8_i32 : i32
    %c0_i32 = arith.constant 0 : i32
    %1 = arith.addi %0, %c0_i32 : i32
    %2 = arith.index_cast %1 : i32 to index
    %3 = memref.load %arg1[%2] : memref<8xi32, #tpu.memory_space<smem>>
    %c0_i32_0 = arith.constant 0 : i32
    %c0_i32_1 = arith.constant 0 : i32
    %c0_i32_2 = arith.constant 0 : i32
    return %3, %c0_i32_0, %c0_i32_1 : i32, i32, i32
  }
  func.func @transform_1(%arg0: i32, %arg1: memref<8xi32, #tpu.memory_space<smem>>) -> (i32, i32, i32) {
    %c8_i32 = arith.constant 8 : i32
    %0 = arith.muli %arg0, %c8_i32 : i32
    %c1_i32 = arith.constant 1 : i32
    %1 = arith.addi %0, %c1_i32 : i32
    %2 = arith.index_cast %1 : i32 to index
    %3 = memref.load %arg1[%2] : memref<8xi32, #tpu.memory_space<smem>>
    %c0_i32 = arith.constant 0 : i32
    %c0_i32_0 = arith.constant 0 : i32
    %c0_i32_1 = arith.constant 0 : i32
    return %3, %c0_i32, %c0_i32_0 : i32, i32, i32
  }
  func.func @transform_2(%arg0: i32, %arg1: memref<8xi32, #tpu.memory_space<smem>>) -> (i32, i32, i32) {
    %c8_i32 = arith.constant 8 : i32
    %0 = arith.muli %arg0, %c8_i32 : i32
    %c2_i32 = arith.constant 2 : i32
    %1 = arith.addi %0, %c2_i32 : i32
    %2 = arith.index_cast %1 : i32 to index
    %3 = memref.load %arg1[%2] : memref<8xi32, #tpu.memory_space<smem>>
    %c0_i32 = arith.constant 0 : i32
    %c0_i32_0 = arith.constant 0 : i32
    %c0_i32_1 = arith.constant 0 : i32
    return %3, %c0_i32, %c0_i32_0 : i32, i32, i32
  }
  func.func @transform_3(%arg0: i32, %arg1: memref<8xi32, #tpu.memory_space<smem>>) -> (i32, i32, i32) {
    %c8_i32 = arith.constant 8 : i32
    %0 = arith.muli %arg0, %c8_i32 : i32
    %c3_i32 = arith.constant 3 : i32
    %1 = arith.addi %0, %c3_i32 : i32
    %2 = arith.index_cast %1 : i32 to index
    %3 = memref.load %arg1[%2] : memref<8xi32, #tpu.memory_space<smem>>
    %c0_i32 = arith.constant 0 : i32
    %c0_i32_0 = arith.constant 0 : i32
    %c0_i32_1 = arith.constant 0 : i32
    return %3, %c0_i32, %c0_i32_0 : i32, i32, i32
  }
  func.func @transform_4(%arg0: i32, %arg1: memref<8xi32, #tpu.memory_space<smem>>) -> (i32, i32, i32) {
    %c8_i32 = arith.constant 8 : i32
    %0 = arith.muli %arg0, %c8_i32 : i32
    %c4_i32 = arith.constant 4 : i32
    %1 = arith.addi %0, %c4_i32 : i32
    %2 = arith.index_cast %1 : i32 to index
    %3 = memref.load %arg1[%2] : memref<8xi32, #tpu.memory_space<smem>>
    %c0_i32 = arith.constant 0 : i32
    %c0_i32_0 = arith.constant 0 : i32
    %c0_i32_1 = arith.constant 0 : i32
    return %3, %c0_i32, %c0_i32_0 : i32, i32, i32
  }
  func.func @transform_5(%arg0: i32, %arg1: memref<8xi32, #tpu.memory_space<smem>>) -> (i32, i32, i32) {
    %c8_i32 = arith.constant 8 : i32
    %0 = arith.muli %arg0, %c8_i32 : i32
    %c5_i32 = arith.constant 5 : i32
    %1 = arith.addi %0, %c5_i32 : i32
    %2 = arith.index_cast %1 : i32 to index
    %3 = memref.load %arg1[%2] : memref<8xi32, #tpu.memory_space<smem>>
    %c0_i32 = arith.constant 0 : i32
    %c0_i32_0 = arith.constant 0 : i32
    %c0_i32_1 = arith.constant 0 : i32
    return %3, %c0_i32, %c0_i32_0 : i32, i32, i32
  }
  func.func @transform_6(%arg0: i32, %arg1: memref<8xi32, #tpu.memory_space<smem>>) -> (i32, i32, i32) {
    %c8_i32 = arith.constant 8 : i32
    %0 = arith.muli %arg0, %c8_i32 : i32
    %c6_i32 = arith.constant 6 : i32
    %1 = arith.addi %0, %c6_i32 : i32
    %2 = arith.index_cast %1 : i32 to index
    %3 = memref.load %arg1[%2] : memref<8xi32, #tpu.memory_space<smem>>
    %c0_i32 = arith.constant 0 : i32
    %c0_i32_0 = arith.constant 0 : i32
    %c0_i32_1 = arith.constant 0 : i32
    return %3, %c0_i32, %c0_i32_0 : i32, i32, i32
  }
  func.func @transform_7(%arg0: i32, %arg1: memref<8xi32, #tpu.memory_space<smem>>) -> (i32, i32, i32) {
    %c8_i32 = arith.constant 8 : i32
    %0 = arith.muli %arg0, %c8_i32 : i32
    %c7_i32 = arith.constant 7 : i32
    %1 = arith.addi %0, %c7_i32 : i32
    %2 = arith.index_cast %1 : i32 to index
    %3 = memref.load %arg1[%2] : memref<8xi32, #tpu.memory_space<smem>>
    %c0_i32 = arith.constant 0 : i32
    %c0_i32_0 = arith.constant 0 : i32
    %c0_i32_1 = arith.constant 0 : i32
    return %3, %c0_i32, %c0_i32_0 : i32, i32, i32
  }
  func.func @transform_8(%arg0: i32, %arg1: memref<8xi32, #tpu.memory_space<smem>>) -> (i32, i32, i32) {
    %c0_i32 = arith.constant 0 : i32
    %c0_i32_0 = arith.constant 0 : i32
    %c0_i32_1 = arith.constant 0 : i32
    return %arg0, %c0_i32, %c0_i32_0 : i32, i32, i32
  }
}

</mosaic_0001>

<bundles_post_ra>
// kernel: tpu_custom_call.1
= control target key start
LH: loop header
LB: loop body
LE: loop exit
PB: predicated region body
PF: predicated region fallthrough
CT: control target
= control target key end

     0   :  { %s275_s0 = inlined_call_operand.hbm [shape: s32[8], index: 0, kind: input, shape index: {}]   ;;  %s276_s1 = inlined_call_operand.hbm [shape: f32[16,32], index: 1, kind: input, shape index: {}]   ;;  %s277_s2 = inlined_call_operand.hbm [shape: f32[1,1,256], index: 2, kind: output, shape index: {}]  }
   0x1   :  { %s155_s11 = scalar_lea.hbm %s275_s0, 16 }
   0x2   :  { %p156_p0 = scmp.ne.s32.totalorder %s275_s0, %s155_s11  ;;  %p159_p1 = scmp.lt.u32.totalorder %s155_s11, %s275_s0 }
   0x4   :  { %p161_p2 = pnand %p159_p1, %p156_p0 }
   0x6   :  { %164 = shalt.err (!%p161_p2)  }
   0x7   :  { %s215_s16 = smov [#allocation3]  }
   0x8   :  { %8 = dma.hbm_to_smem %s275_s0, 16, %s215_s16, [#allocation2] }
   0x9   :  { %209 = dma.done.wait [#allocation2], 16 }
   0xa   :  { %210 = vsyncadd [#allocation2], 4294967280 }
   0xb   :  { %10 = sfence }
   0xc   :  { %11 = vsyncpa [#allocation5], 0 }
   0xd   :  { %12 = vsyncpa [#allocation6], 0  ;;  %s216_s19 = smov [#allocation4]   ;;  %s165_s23 = scalar_lea.hbm %s276_s1, 256 }
   0xe   :  { %s18_s20 = sshll.u32 %s216_s19, 4  ;;  %p166_p3 = scmp.ne.s32.totalorder %s276_s1, %s165_s23  ;;  %s19_s20 = int_to_ptr.vmem [resolvable:$true] %s18_s20 }
   0xf   :  { %p169_p4 = scmp.lt.u32.totalorder %s165_s23, %s276_s1 }
  0x11   :  { %p171_p5 = pnand %p169_p4, %p166_p3 }
  0x13   :  { %174 = shalt.err (!%p171_p5)
}
  0x14   :  { %s175_s0 = scalar_lea.vmem %s19_s20, 256  ;;  %p180_p7 = scmp.lt.s32.totalorder %s19_s20, %s19_s20 }
  0x15   :  { %p176_p6 = scmp.ne.s32.totalorder %s19_s20, %s175_s0  ;;  %p181_p8 = scmp.lt.s32.totalorder %s175_s0, %s175_s0 }
  0x17   :  { %p182_p9 = por %p181_p8, %p180_p7 }
  0x19   :  { %p183_p10 = pnand %p182_p9, %p176_p6 }
  0x1b   :  { %186 = shalt.err (!%p183_p10)
}
  0x1c   :  { %s217_s28 = smov 128   ;;  %s218_s29 = smov 8  }
  0x1d   :  { %24 = dma.hbm_to_vmem [thread:$0]  %s276_s1, 256, %s19_s20, [#allocation5], %s217_s28, %s217_s28, %s218_s29  }
  0x1e   :  { %211 = dma.done.wait [#allocation5], 256  }
  0x1f   :  { %212 = vsyncadd [#allocation5], 4294967040  ;;  %s140_s4 = sld [smem:[#allocation3 + $0x2]]  ;;  %s139_s5 = sld [smem:[#allocation3 + $0x1]]  ;;  %v222_v8 = vmov 1966171168   ;;  %v99_v10 = vlaneseq }
  0x20   :  { %s144_s6 = sld [smem:[#allocation3 + $0x6]]  ;;  %s143_s7 = sld [smem:[#allocation3 + $0x5]]  ;;  %v97_v9 = vunpack.c.l.s4 %v222_v8  ;;  %vm84_vm0 = vcmask 261120   ;;  %vm86_vm1 = vcmask 523264   ;;  %vm88_vm2 = vcmask 785408  }
  0x21   :  { %s145_s8 = sld [smem:[#allocation3 + $0x7]]  ;;  %s141_s9 = sld [smem:[#allocation3 + $0x3]]  ;;  %v100_v16 = vshrl.u32 %v99_v10, 7  ;;  %vm113_vm3 = vcmp.lt.s32.totalorder %v99_v10, 256 }
  0x22   :  { %s219_s12 = smov 64   ;;  %s220_s13 = smov 32   ;;  %v98_v15 = vunpack.c.0.s8 %v97_v9 }
  0x23   :  { %s221_s17 = smov 96   ;;  %s29_s18 = sld [smem:[#allocation3]] }
  0x24   :  { %s142_s19 = sld [smem:[#allocation3 + $0x4]]  ;;  %v101_v21 = vsub.s32 %v98_v15, %v100_v16  ;;  %s223_s22 = smov [#allocation7]  }
  0x25   :  { %s38_s10 = scalar_lea.vmem [#allocation4], %s140_s4  ;;  %s34_s11 = scalar_lea.vmem [#allocation4], %s139_s5 }
  0x26   :  { %v39_v0 = vld [vmem:[%s38_s10] sm:$0x1]  ;;  %s54_s14 = scalar_lea.vmem [#allocation4], %s144_s6  ;;  %s50_s15 = scalar_lea.vmem [#allocation4], %s143_s7 }
  0x27   :  { %v35_v1 = vld [vmem:[%s34_s11] sm:$0x1]  ;;  %65 = vrot.lane.b32.xlu1 %v39_v0, %s219_s12  ;;  %s58_s1 = scalar_lea.vmem [#allocation4], %s145_s8  ;;  %s42_s16 = scalar_lea.vmem [#allocation4], %s141_s9 }
  0x28   :  { %61 = vrot.lane.b32.xlu0 %v35_v1, %s220_s13  ;;  %v55_v2 = vld [vmem:[%s54_s14] sm:$0x1]  ;;  %s122_s23 = sshll.u32 %s223_s22, 4  ;;  %s123_s23 = int_to_ptr.vmem [resolvable:$true] %s122_s23 }
  0x29   :  { %v51_v3 = vld [vmem:[%s50_s15] sm:$0x1]  ;;  %s30_s20 = scalar_lea.vmem [#allocation4], %s29_s18  ;;  %s187_s24 = scalar_lea.vmem %s123_s23, 32 }
  0x2a   :  { %v59_v4 = vld [vmem:[%s58_s1] sm:$0x1]  ;;  %s46_s21 = scalar_lea.vmem [#allocation4], %s142_s19  ;;  %p188_p11 = scmp.ne.s32.totalorder %s123_s23, %s187_s24 }
  0x2b   :  { %77 = vrot.lane.b32.xlu1 %v55_v2, %s219_s12  ;;  %v43_v5 = vld [vmem:[%s42_s16] sm:$0x1]  ;;  %p192_p12 = scmp.lt.s32.totalorder %s123_s23, %s123_s23  ;;  %p193_p13 = scmp.lt.s32.totalorder %s187_s24, %s187_s24 }
  0x2c   :  { %73 = vrot.lane.b32.xlu0 %v51_v3, %s220_s13  ;;  %v31_v11 = vld [vmem:[%s30_s20] sm:$0x1] }
  0x2d   :  { %v47_v12 = vld [vmem:[%s46_s21] sm:$0x1]  ;;  %p194_p0 = por %p193_p13, %p192_p12 }
  0x2f   :  { %81 = vrot.lane.b32.xlu1 %v59_v4, %s221_s17  ;;  %p195_p1 = pnand %p194_p0, %p188_p11 }
  0x30   :  { %69 = vrot.lane.b32.xlu0 %v43_v5, %s221_s17 }
  0x99   :  { %v66_v6 = vpop.permute.xlu1 %65 }
  0x9a   :  { %v62_v7 = vpop.permute.xlu0 %61 }
  0x9b   :  { %v85_v17 = vsel %vm84_vm0, %v31_v11, %v62_v7 }
  0x9c   :  { %v87_v23 = vsel %vm86_vm1, %v85_v17, %v66_v6 }
  0x9d   :  { %v78_v13 = vpop.permute.xlu1 %77 }
  0x9e   :  { %v74_v14 = vpop.permute.xlu0 %73 }
  0x9f   :  { %v90_v18 = vsel %vm84_vm0, %v47_v12, %v74_v14 }
  0xa0   :  { %v91_v20 = vsel %vm86_vm1, %v90_v18, %v78_v13 }
  0xa1   :  { %v82_v19 = vpop.permute.xlu1 %81 }
  0xa2   :  { %v70_v22 = vpop.permute.xlu0 %69  ;;  %v92_v24 = vsel %vm88_vm2, %v91_v20, %v82_v19 }
  0xa3   :  { %v89_v25 = vsel %vm88_vm2, %v87_v23, %v70_v22 }
  0xa4   :  { %v95_v26 = vcombine.low %v89_v25, %v92_v24 }
  0xa6   :  { %v102_v27 = vrot.slane %v95_v26, %v101_v21 }
  0xa8   :  { %v109_v28 = vrot.slane %v102_v27, %v101_v21 }
  0xaa   :  { %115 = vst.msk [vmem:[#allocation7] sm:$0x3] %vm113_vm3, %v109_v28 }
  0xab   :  { %198 = shalt.err (!%p195_p1)
}
  0xac   :  { %s199_s27 = scalar_lea.hbm %s277_s2, 32 }
  0xad   :  { %p200_p2 = scmp.ne.s32.totalorder %s277_s2, %s199_s27  ;;  %p203_p3 = scmp.lt.u32.totalorder %s199_s27, %s277_s2 }
  0xaf   :  { %p205_p4 = pnand %p203_p3, %p200_p2 }
  0xb1   :  { %208 = shalt.err (!%p205_p4)
}
  0xb2   :  { %125 = dma.vmem_to_hbm [thread:$0]  %s123_s23, 32, %s277_s2, [#allocation6]  }
  0xb3   :  { %213 = dma.done.wait [#allocation6], 32  }
  0xb4   :  { %214 = vsyncadd [#allocation6], 4294967264 }
  0xb5   :  { %129 = vsyncpa [#allocation5], 1 }
  0xb6   :  { %130 = vsyncpa [#allocation6], 1 }

// kernel: tpu_custom_call.1
= control target key start
LH: loop header
LB: loop body
LE: loop exit
PB: predicated region body
PF: predicated region fallthrough
CT: control target
= control target key end

     0   :  { %s773_s0 = inlined_call_operand.hbm [shape: s32[8], index: 0, kind: input, shape index: {}]   ;;  %s774_s1 = inlined_call_operand.hbm [shape: f32[16,1,32], index: 1, kind: input, shape index: {}]   ;;  %s775_s2 = inlined_call_operand.hbm [shape: f32[16,1,32], index: 2, kind: input, shape index: {}]   ;;  %s776_s3 = inlined_call_operand.hbm [shape: f32[16,1,32], index: 3, kind: input, shape index: {}]   ;;  %s777_s4 = inlined_call_operand.hbm [shape: f32[16,1,32], index: 4, kind: input, shape index: {}]   ;;  %s778_s5 = inlined_call_operand.vmem [shape: f32[16,1,32], index: 5, kind: input, shape index: {}]   ;;  %s779_s6 = inlined_call_operand.hbm [shape: f32[16,1,32], index: 6, kind: input, shape index: {}]   ;;  %s780_s7 = inlined_call_operand.hbm [shape: f32[16,1,32], index: 7, kind: input, shape index: {}]   ;;  %s781_s8 = inlined_call_operand.hbm [shape: f32[16,1,32], index: 8, kind: input, shape index: {}]   ;;  %s782_s9 = inlined_call_operand.hbm [shape: f32[1,1,256], index: 9, kind: output, shape index: {}]  }
   0x1   :  { %s350_s11 = scalar_lea.hbm %s773_s0, 16 }
   0x2   :  { %p351_p0 = scmp.ne.s32.totalorder %s773_s0, %s350_s11  ;;  %p354_p1 = scmp.lt.u32.totalorder %s350_s11, %s773_s0 }
   0x4   :  { %p356_p2 = pnand %p354_p1, %p351_p0 }
   0x6   :  { %359 = shalt.err (!%p356_p2)  }
   0x7   :  { %s562_s16 = smov [#allocation3]  }
   0x8   :  { %15 = dma.hbm_to_smem %s773_s0, 16, %s562_s16, [#allocation2] }
   0x9   :  { %550 = dma.done.wait [#allocation2], 16 }
   0xa   :  { %551 = vsyncadd [#allocation2], 4294967280 }
   0xb   :  { %17 = sfence }
   0xc   :  { %18 = vsyncpa [#allocation5], 0 }
   0xd   :  { %19 = vsyncpa [#allocation8], 0 }
   0xe   :  { %20 = vsyncpa [#allocation11], 0 }
   0xf   :  { %21 = vsyncpa [#allocation14], 0  ;;  %s318_s19 = sld [smem:[#allocation3 + $0x1]] }
  0x10   :  { %22 = vsyncpa [#allocation6], 0  ;;  %s563_s20 = smov [#allocation7]   ;;  %s637_s22 = sld [smem:[#allocation3 + $0x3]] }
  0x11   :  { %s48_s21 = sshll.u32 %s563_s20, 4  ;;  %s564_s23 = smov [#allocation10]   ;;  %s639_s21 = int_to_ptr.vmem [resolvable:$true] %s48_s21 }
  0x12   :  { %s78_s24 = sshll.u32 %s564_s23, 4  ;;  %s641_s25 = sld [smem:[#allocation3 + $0x6]]  ;;  %s643_s24 = int_to_ptr.vmem [resolvable:$true] %s78_s24 }
  0x13   :  { %s565_s0 = smov [#allocation13]   ;;  %s645_s27 = sld [smem:[#allocation3]] }
  0x14   :  { %s119_s26 = sshll.u32 %s565_s0, 4  ;;  %s362_s15 = scalar_lea.hbm %s775_s2, 256  ;;  %s647_s26 = int_to_ptr.vmem [resolvable:$true] %s119_s26 }
  0x15   :  { %s319_s28 = sshll.u32 %s318_s19, 4 }
  0x16   :  { %s46_s10 = scalar_lea.hbm %s775_s2, %s319_s28  ;;  %s323_s11 = sshll.u32 %s637_s22, 4 }
  0x17   :  { %s360_s12 = scalar_lea.hbm %s46_s10, 16  ;;  %p363_p4 = scmp.lt.u32.totalorder %s46_s10, %s775_s2 }
  0x18   :  { %p361_p3 = scmp.ne.s32.totalorder %s46_s10, %s360_s12  ;;  %p364_p5 = scmp.lt.u32.totalorder %s362_s15, %s360_s12 }
  0x19   :  { %p366_p7 = scmp.lt.u32.totalorder %s360_s12, %s46_s10 }
  0x1a   :  { %p365_p6 = por %p364_p5, %p363_p4 }
  0x1c   :  { %p367_p8 = por %p366_p7, %p365_p6 }
  0x1e   :  { %p368_p9 = pnand %p367_p8, %p361_p3 }
  0x20   :  { %371 = shalt.err (!%p368_p9)
}
  0x21   :  { %s372_s18 = scalar_lea.vmem %s639_s21, 16  ;;  %s376_s19 = scalar_lea.vmem %s639_s21, 32 }
  0x22   :  { %p373_p10 = scmp.ne.s32.totalorder %s639_s21, %s372_s18  ;;  %p377_p11 = scmp.lt.s32.totalorder %s639_s21, %s639_s21 }
  0x23   :  { %p378_p12 = scmp.lt.s32.totalorder %s376_s19, %s372_s18 }
  0x25   :  { %p379_p13 = por %p378_p12, %p377_p11 }
  0x27   :  { %p380_p0 = pnand %p379_p13, %p373_p10 }
  0x29   :  { %383 = shalt.err (!%p380_p0)
}
  0x2a   :  { %51 = dma.hbm_to_vmem [thread:$0]  %s46_s10, 16, %s639_s21, [#allocation8]  }
  0x2b   :  { %s76_s22 = scalar_lea.hbm %s777_s4, %s323_s11  ;;  %s327_s23 = sshll.u32 %s641_s25, 4 }
  0x2c   :  { %s384_s0 = scalar_lea.hbm %s76_s22, 16  ;;  %s386_s30 = scalar_lea.hbm %s777_s4, 256 }
  0x2d   :  { %p385_p1 = scmp.ne.s32.totalorder %s76_s22, %s384_s0  ;;  %p387_p2 = scmp.lt.u32.totalorder %s76_s22, %s777_s4 }
  0x2e   :  { %p388_p3 = scmp.lt.u32.totalorder %s386_s30, %s384_s0  ;;  %p390_p5 = scmp.lt.u32.totalorder %s384_s0, %s76_s22 }
  0x30   :  { %p389_p4 = por %p388_p3, %p387_p2 }
  0x32   :  { %p391_p6 = por %p390_p5, %p389_p4 }
  0x34   :  { %p392_p7 = pnand %p391_p6, %p385_p1 }
  0x36   :  { %395 = shalt.err (!%p392_p7)
}
  0x37   :  { %s396_s21 = scalar_lea.vmem %s643_s24, 16  ;;  %s400_s25 = scalar_lea.vmem %s643_s24, 32 }
  0x38   :  { %p397_p8 = scmp.ne.s32.totalorder %s643_s24, %s396_s21  ;;  %p401_p9 = scmp.lt.s32.totalorder %s643_s24, %s643_s24 }
  0x39   :  { %p402_p10 = scmp.lt.s32.totalorder %s400_s25, %s396_s21 }
  0x3b   :  { %p403_p11 = por %p402_p10, %p401_p9 }
  0x3d   :  { %p404_p12 = pnand %p403_p11, %p397_p8 }
  0x3f   :  { %407 = shalt.err (!%p404_p12)
}
  0x40   :  { %81 = dma.hbm_to_vmem [thread:$0]  %s76_s22, 16, %s643_s24, [#allocation11]  }
  0x41   :  { %s117_s11 = scalar_lea.hbm %s780_s7, %s327_s23  ;;  %s317_s14 = sshll.u32 %s645_s27, 4 }
  0x42   :  { %s408_s15 = scalar_lea.hbm %s117_s11, 16  ;;  %s410_s18 = scalar_lea.hbm %s780_s7, 256 }
  0x43   :  { %p409_p13 = scmp.ne.s32.totalorder %s117_s11, %s408_s15  ;;  %p411_p0 = scmp.lt.u32.totalorder %s117_s11, %s780_s7 }
  0x44   :  { %p412_p1 = scmp.lt.u32.totalorder %s410_s18, %s408_s15  ;;  %p414_p3 = scmp.lt.u32.totalorder %s408_s15, %s117_s11 }
  0x46   :  { %p413_p2 = por %p412_p1, %p411_p0 }
  0x48   :  { %p415_p4 = por %p414_p3, %p413_p2 }
  0x4a   :  { %p416_p5 = pnand %p415_p4, %p409_p13 }
  0x4c   :  { %419 = shalt.err (!%p416_p5)
}
  0x4d   :  { %s420_s24 = scalar_lea.vmem %s647_s26, 16  ;;  %s424_s27 = scalar_lea.vmem %s647_s26, 32 }
  0x4e   :  { %p421_p6 = scmp.ne.s32.totalorder %s647_s26, %s420_s24  ;;  %p425_p7 = scmp.lt.s32.totalorder %s647_s26, %s647_s26 }
  0x4f   :  { %p426_p8 = scmp.lt.s32.totalorder %s424_s27, %s420_s24 }
  0x51   :  { %p427_p9 = por %p426_p8, %p425_p7 }
  0x53   :  { %p428_p10 = pnand %p427_p9, %p421_p6 }
  0x55   :  { %431 = shalt.err (!%p428_p10)
}
  0x56   :  { %122 = dma.hbm_to_vmem [thread:$0]  %s117_s11, 16, %s647_s26, [#allocation14]  }
  0x57   :  { %s31_s22 = scalar_lea.hbm %s774_s1, %s317_s14  ;;  %s566_s23 = smov [#allocation4]  }
  0x58   :  { %s33_s0 = sshll.u32 %s566_s23, 4  ;;  %s700_s28 = sld [smem:[#allocation3 + $0x2]]  ;;  %s34_s0 = int_to_ptr.vmem [resolvable:$true] %s33_s0 }
  0x59   :  { %s432_s29 = scalar_lea.hbm %s31_s22, 16  ;;  %s434_s13 = scalar_lea.hbm %s774_s1, 256 }
  0x5a   :  { %p433_p11 = scmp.ne.s32.totalorder %s31_s22, %s432_s29  ;;  %p435_p12 = scmp.lt.u32.totalorder %s31_s22, %s774_s1 }
  0x5b   :  { %p436_p13 = scmp.lt.u32.totalorder %s434_s13, %s432_s29  ;;  %p438_p1 = scmp.lt.u32.totalorder %s432_s29, %s31_s22 }
  0x5d   :  { %p437_p0 = por %p436_p13, %p435_p12 }
  0x5f   :  { %p439_p2 = por %p438_p1, %p437_p0 }
  0x61   :  { %p440_p3 = pnand %p439_p2, %p433_p11 }
  0x63   :  { %443 = shalt.err (!%p440_p3)
}
  0x64   :  { %s444_s26 = scalar_lea.vmem %s34_s0, 16  ;;  %s448_s4 = scalar_lea.vmem %s34_s0, 32 }
  0x65   :  { %p445_p4 = scmp.ne.s32.totalorder %s34_s0, %s444_s26  ;;  %p449_p5 = scmp.lt.s32.totalorder %s34_s0, %s34_s0 }
  0x66   :  { %p450_p6 = scmp.lt.s32.totalorder %s448_s4, %s444_s26 }
  0x68   :  { %p451_p7 = por %p450_p6, %p449_p5 }
  0x6a   :  { %p452_p8 = pnand %p451_p7, %p445_p4 }
  0x6c   :  { %455 = shalt.err (!%p452_p8)
}
  0x6d   :  { %36 = dma.hbm_to_vmem [thread:$0]  %s31_s22, 16, %s34_s0, [#allocation5]  }
  0x6e   :  { %s567_s10 = smov [#allocation9]   ;;  %s708_s14 = sld [smem:[#allocation3 + $0x5]] }
  0x6f   :  { %s63_s11 = sshll.u32 %s567_s10, 4  ;;  %s568_s1 = smov [#allocation12]   ;;  %s64_s11 = int_to_ptr.vmem [resolvable:$true] %s63_s11 }
  0x70   :  { %s104_s15 = sshll.u32 %s568_s1, 4  ;;  %s710_s16 = sld [smem:[#allocation3 + $0x7]]  ;;  %s713_s15 = int_to_ptr.vmem [resolvable:$true] %s104_s15 }
  0x71   :  { %s321_s17 = sshll.u32 %s700_s28, 4  ;;  %s458_s20 = scalar_lea.hbm %s776_s3, 256 }
  0x72   :  { %s61_s2 = scalar_lea.hbm %s776_s3, %s321_s17 }
  0x73   :  { %s456_s24 = scalar_lea.hbm %s61_s2, 16  ;;  %p459_p10 = scmp.lt.u32.totalorder %s61_s2, %s776_s3 }
  0x74   :  { %p457_p9 = scmp.ne.s32.totalorder %s61_s2, %s456_s24  ;;  %p460_p11 = scmp.lt.u32.totalorder %s458_s20, %s456_s24 }
  0x75   :  { %p462_p13 = scmp.lt.u32.totalorder %s456_s24, %s61_s2 }
  0x76   :  { %p461_p12 = por %p460_p11, %p459_p10 }
  0x78   :  { %p463_p0 = por %p462_p13, %p461_p12 }
  0x7a   :  { %p464_p1 = pnand %p463_p0, %p457_p9 }
  0x7c   :  { %467 = shalt.err (!%p464_p1)
}
  0x7d   :  { %s468_s0 = scalar_lea.vmem %s64_s11, 16  ;;  %s472_s28 = scalar_lea.vmem %s64_s11, 32 }
  0x7e   :  { %p469_p2 = scmp.ne.s32.totalorder %s64_s11, %s468_s0  ;;  %p473_p3 = scmp.lt.s32.totalorder %s64_s11, %s64_s11 }
  0x7f   :  { %p474_p4 = scmp.lt.s32.totalorder %s472_s28, %s468_s0 }
  0x81   :  { %p475_p5 = por %p474_p4, %p473_p3 }
  0x83   :  { %p476_p6 = pnand %p475_p5, %p469_p2 }
  0x85   :  { %479 = shalt.err (!%p476_p6)
}
  0x86   :  { %66 = dma.hbm_to_vmem [thread:$0]  %s61_s2, 16, %s64_s11, [#allocation8]  }
  0x87   :  { %s325_s29 = sshll.u32 %s708_s14, 4  ;;  %s569_s30 = smov [#allocation15]  }
  0x88   :  { %s134_s12 = sshll.u32 %s569_s30, 4  ;;  %s102_s21 = scalar_lea.hbm %s779_s6, %s325_s29  ;;  %s728_s12 = int_to_ptr.vmem [resolvable:$true] %s134_s12 }
  0x89   :  { %s480_s25 = scalar_lea.hbm %s102_s21, 16  ;;  %s482_s10 = scalar_lea.hbm %s779_s6, 256 }
  0x8a   :  { %p481_p7 = scmp.ne.s32.totalorder %s102_s21, %s480_s25  ;;  %p483_p8 = scmp.lt.u32.totalorder %s102_s21, %s779_s6 }
  0x8b   :  { %p484_p9 = scmp.lt.u32.totalorder %s482_s10, %s480_s25  ;;  %p486_p11 = scmp.lt.u32.totalorder %s480_s25, %s102_s21 }
  0x8d   :  { %p485_p10 = por %p484_p9, %p483_p8 }
  0x8f   :  { %p487_p12 = por %p486_p11, %p485_p10 }
  0x91   :  { %p488_p13 = pnand %p487_p12, %p481_p7 }
  0x93   :  { %491 = shalt.err (!%p488_p13)
}
  0x94   :  { %s492_s11 = scalar_lea.vmem %s713_s15, 16  ;;  %s496_s14 = scalar_lea.vmem %s713_s15, 32 }
  0x95   :  { %p493_p0 = scmp.ne.s32.totalorder %s713_s15, %s492_s11  ;;  %p497_p1 = scmp.lt.s32.totalorder %s713_s15, %s713_s15 }
  0x96   :  { %p498_p2 = scmp.lt.s32.totalorder %s496_s14, %s492_s11 }
  0x98   :  { %p499_p3 = por %p498_p2, %p497_p1 }
  0x9a   :  { %p500_p4 = pnand %p499_p3, %p493_p0 }
  0x9c   :  { %503 = shalt.err (!%p500_p4)
}
  0x9d   :  { %107 = dma.hbm_to_vmem [thread:$0]  %s102_s21, 16, %s713_s15, [#allocation11]  }
  0x9e   :  { %s329_s6 = sshll.u32 %s710_s16, 4  ;;  %s506_s20 = scalar_lea.hbm %s781_s8, 256 }
  0x9f   :  { %s132_s2 = scalar_lea.hbm %s781_s8, %s329_s6 }
  0xa0   :  { %s504_s24 = scalar_lea.hbm %s132_s2, 16  ;;  %p507_p6 = scmp.lt.u32.totalorder %s132_s2, %s781_s8 }
  0xa1   :  { %p505_p5 = scmp.ne.s32.totalorder %s132_s2, %s504_s24  ;;  %p508_p7 = scmp.lt.u32.totalorder %s506_s20, %s504_s24 }
  0xa2   :  { %p510_p9 = scmp.lt.u32.totalorder %s504_s24, %s132_s2 }
  0xa3   :  { %p509_p8 = por %p508_p7, %p507_p6 }
  0xa5   :  { %p511_p10 = por %p510_p9, %p509_p8 }
  0xa7   :  { %p512_p11 = pnand %p511_p10, %p505_p5 }
  0xa9   :  { %515 = shalt.err (!%p512_p11)
}
  0xaa   :  { %s516_s15 = scalar_lea.vmem %s728_s12, 16  ;;  %s520_s16 = scalar_lea.vmem %s728_s12, 32 }
  0xab   :  { %p517_p12 = scmp.ne.s32.totalorder %s728_s12, %s516_s15  ;;  %p521_p13 = scmp.lt.s32.totalorder %s728_s12, %s728_s12 }
  0xac   :  { %p522_p0 = scmp.lt.s32.totalorder %s520_s16, %s516_s15 }
  0xae   :  { %p523_p1 = por %p522_p0, %p521_p13 }
  0xb0   :  { %p524_p2 = pnand %p523_p1, %p517_p12 }
  0xb2   :  { %527 = shalt.err (!%p524_p2)
}
  0xb3   :  { %137 = dma.hbm_to_vmem [thread:$0]  %s132_s2, 16, %s728_s12, [#allocation14]  }
  0xb4   :  { %552 = dma.done.wait [#allocation5], 16  }
  0xb5   :  { %553 = vsyncadd [#allocation5], 4294967280 }
  0xb6   :  { %554 = dma.done.wait [#allocation8], 32  }
  0xb7   :  { %555 = vsyncadd [#allocation8], 4294967264 }
  0xb8   :  { %556 = dma.done.wait [#allocation11], 32  }
  0xb9   :  { %557 = vsyncadd [#allocation11], 4294967264 }
  0xba   :  { %558 = dma.done.wait [#allocation14], 32  }
  0xbb   :  { %559 = vsyncadd [#allocation14], 4294967264  ;;  %v332_v0 = vld [vmem:[#allocation9] ss:$0 sm:$0xff]  ;;  %v331_v1 = vld [vmem:[#allocation7] ss:$0 sm:$0xff]  ;;  %v265_v10 = vlaneseq }
  0xbc   :  { %s570_s8 = smov 64   ;;  %s571_s0 = smov 32   ;;  %v335_v2 = vld [vmem:[#allocation13] ss:$0 sm:$0xff]  ;;  %v334_v3 = vld [vmem:[#allocation12] ss:$0 sm:$0xff] }
  0xbd   :  { %215 = vrot.lane.b32.xlu1 %v332_v0, %s570_s8  ;;  %207 = vrot.lane.b32.xlu0 %v331_v1, %s571_s0  ;;  %v336_v4 = vld [vmem:[#allocation15] ss:$0 sm:$0xff]  ;;  %v333_v5 = vld [vmem:[#allocation10] ss:$0 sm:$0xff]  ;;  %s572_s28 = smov 96   ;;  %s330_s29 = sld [smem:[#allocation3 + $0x4]] }
  0xbe   :  { %v573_v8 = vmov 1966171168   ;;  %vm250_vm0 = vcmask 261120   ;;  %v194_v11 = vld [vmem:[#allocation4] sm:$0x1]  ;;  %v266_v16 = vshrl.u32 %v265_v10, 7 }
  0xbf   :  { %v263_v9 = vunpack.c.l.s4 %v573_v8  ;;  %vm252_vm1 = vcmask 523264   ;;  %vm254_vm2 = vcmask 785408   ;;  %vm279_vm3 = vcmp.lt.s32.totalorder %v265_v10, 256 }
  0xc1   :  { %239 = vrot.lane.b32.xlu1 %v335_v2, %s570_s8  ;;  %231 = vrot.lane.b32.xlu0 %v334_v3, %s571_s0  ;;  %v264_v15 = vunpack.c.0.s8 %v263_v9 }
  0xc3   :  { %p179_p3 = scmp.lt.s32.totalorder %s330_s29, 15  ;;  %v267_v21 = vsub.s32 %v264_v15, %v266_v16 }
  0xc5   :  { %247 = vrot.lane.b32.xlu1 %v336_v4, %s572_s28  ;;  %223 = vrot.lane.b32.xlu0 %v333_v5, %s572_s28  ;;  %s784_s29 = smov (!%p179_p3, %s330_s29), 15 }
  0xc6   :  { %s181_s3 = scalar_lea.vmem %s778_s5, %s784_s29  ;;  %s574_s5 = smov [#allocation16]  }
  0xc7   :  { %v198_v12 = vld [vmem:[%s181_s3] sm:$0x1]  ;;  %s288_s13 = sshll.u32 %s574_s5, 4  ;;  %s289_s13 = int_to_ptr.vmem [resolvable:$true] %s288_s13 }
  0xc8   :  { %s528_s21 = scalar_lea.vmem %s289_s13, 32  ;;  %p533_p5 = scmp.lt.s32.totalorder %s289_s13, %s289_s13 }
  0xc9   :  { %p529_p4 = scmp.ne.s32.totalorder %s289_s13, %s528_s21  ;;  %p534_p6 = scmp.lt.s32.totalorder %s528_s21, %s528_s21 }
  0xcb   :  { %p535_p7 = por %p534_p6, %p533_p5 }
  0xcd   :  { %p536_p8 = pnand %p535_p7, %p529_p4 }
 0x12f   :  { %v216_v6 = vpop.permute.xlu1 %215  ;;  %v208_v7 = vpop.permute.xlu0 %207 }
 0x130   :  { %v251_v17 = vsel %vm250_vm0, %v194_v11, %v208_v7 }
 0x131   :  { %v253_v23 = vsel %vm252_vm1, %v251_v17, %v216_v6 }
 0x133   :  { %v240_v13 = vpop.permute.xlu1 %239  ;;  %v232_v14 = vpop.permute.xlu0 %231 }
 0x134   :  { %v256_v18 = vsel %vm250_vm0, %v198_v12, %v232_v14 }
 0x135   :  { %v257_v20 = vsel %vm252_vm1, %v256_v18, %v240_v13 }
 0x137   :  { %v248_v19 = vpop.permute.xlu1 %247  ;;  %v224_v22 = vpop.permute.xlu0 %223 }
 0x138   :  { %v258_v24 = vsel %vm254_vm2, %v257_v20, %v248_v19  ;;  %v255_v25 = vsel %vm254_vm2, %v253_v23, %v224_v22 }
 0x139   :  { %v261_v26 = vcombine.low %v255_v25, %v258_v24 }
 0x13b   :  { %v268_v27 = vrot.slane %v261_v26, %v267_v21 }
 0x13d   :  { %v275_v28 = vrot.slane %v268_v27, %v267_v21 }
 0x13f   :  { %281 = vst.msk [vmem:[#allocation16] sm:$0x3] %vm279_vm3, %v275_v28 }
 0x140   :  { %539 = shalt.err (!%p536_p8)
}
 0x141   :  { %s540_s4 = scalar_lea.hbm %s782_s9, 32 }
 0x142   :  { %p541_p9 = scmp.ne.s32.totalorder %s782_s9, %s540_s4  ;;  %p544_p10 = scmp.lt.u32.totalorder %s540_s4, %s782_s9 }
 0x144   :  { %p546_p11 = pnand %p544_p10, %p541_p9 }
 0x146   :  { %549 = shalt.err (!%p546_p11)
}
 0x147   :  { %291 = dma.vmem_to_hbm [thread:$0]  %s289_s13, 32, %s782_s9, [#allocation6]  }
 0x148   :  { %560 = dma.done.wait [#allocation6], 32  }
 0x149   :  { %561 = vsyncadd [#allocation6], 4294967264 }
 0x14a   :  { %295 = vsyncpa [#allocation5], 1 }
 0x14b   :  { %296 = vsyncpa [#allocation8], 1 }
 0x14c   :  { %297 = vsyncpa [#allocation11], 1 }
 0x14d   :  { %298 = vsyncpa [#allocation14], 1 }
 0x14e   :  { %299 = vsyncpa [#allocation6], 1 }

</bundles_post_ra>
